<compile_context>
chip_gen: v5e
topology: v5e:2x2
jax: 0.10.0
libtpu: 0.0.40
codegen_flags: <defaults>
</compile_context>

<pallas_src>
import jax
import jax.numpy as jnp
from jax.experimental import pallas as pl
from jax.experimental.pallas import tpu as pltpu


# ----------------------------------------------------------------------------
# Mish (x * tanh(softplus(x))), written with a numerically stable softplus that
# lowers cleanly in Mosaic (exp/log/tanh/abs/max only). Shared by kernel & ref.
# ----------------------------------------------------------------------------
def _mish(x):
    sp = jnp.maximum(x, 0.0) + jnp.log(1.0 + jnp.exp(-jnp.abs(x)))
    return x * jnp.tanh(sp)


# ----------------------------------------------------------------------------
# Fused Pallas kernel: avg-pool + 4 linear layers + activations, all in VMEM.
# ----------------------------------------------------------------------------
def _trans_inten_kernel(a_ref, b_ref,
                        w1_ref, b1_ref,
                        w2_ref, b2_ref,
                        w3a_ref, w3b_ref, b3_ref,
                        w4_ref, b4_ref,
                        o_ref):
    # a_ref: (N, a_dim, H*W)   b_ref: (N, b_dim, H*W)   (lane-dense last axis)
    # AdaptiveAvgPool2d([1,1]) + squeeze -> mean over the flattened spatial axis.
    a = jnp.mean(a_ref[...], axis=-1)                    # (N, a_dim)
    b = jnp.mean(b_ref[...], axis=-1)                    # (N, b_dim)

    f1 = _mish(jnp.dot(a, w1_ref[...],
                       preferred_element_type=jnp.float32) + b1_ref[...])
    f2 = _mish(jnp.dot(b, w2_ref[...],
                       preferred_element_type=jnp.float32) + b2_ref[...])
    # layer3 acts on cat([f1, f2], dim=1); the concat is folded into a row-split
    # of W3 (two accumulated matmuls), so no in-kernel concatenate is needed.
    f3 = _mish(jnp.dot(f1, w3a_ref[...], preferred_element_type=jnp.float32)
               + jnp.dot(f2, w3b_ref[...], preferred_element_type=jnp.float32)
               + b3_ref[...])
    inten = jax.nn.sigmoid(jnp.dot(f3, w4_ref[...],
                                   preferred_element_type=jnp.float32)
                           + b4_ref[...])
    o_ref[...] = inten.astype(o_ref.dtype)               # (N, a_dim)


def trans_inten_forward(params, a_nchw, b_nchw):
    """a_nchw: (N, a_dim, H, W), b_nchw: (N, b_dim, H, W) -> (N, a_dim, 1, 1)."""
    N, a_dim, Ha, Wa = a_nchw.shape
    _, b_dim, Hb, Wb = b_nchw.shape
    # Contiguous reshape (no data movement): spatial dims collapse onto lanes.
    a3 = a_nchw.reshape(N, a_dim, Ha * Wa)
    b3 = b_nchw.reshape(N, b_dim, Hb * Wb)

    vmem = pl.BlockSpec(memory_space=pltpu.MemorySpace.VMEM)
    out = pl.pallas_call(
        _trans_inten_kernel,
        out_shape=jax.ShapeDtypeStruct((N, a_dim), jnp.float32),
        in_specs=[vmem] * 11,
        out_specs=vmem,
    )(a3, b3,
      params["w1"], params["b1"],
      params["w2"], params["b2"],
      params["w3a"], params["w3b"], params["b3"],
      params["w4"], params["b4"])
    return out.reshape(N, a_dim, 1, 1)                   # unsqueeze(-1).unsqueeze(-1)


# ----------------------------------------------------------------------------
# Deterministic synthetic parameters (Linear weights stored as (in, out)).
# ----------------------------------------------------------------------------
def make_params(a_dim, b_dim, key):
    ks = jax.random.split(key, 4)

    def lin(k, din, dout):
        kw, kb = jax.random.split(k)
        w = jax.random.normal(kw, (din, dout), jnp.float32) / jnp.sqrt(din)
        b = 0.1 * jax.random.normal(kb, (1, dout), jnp.float32)
        return w, b

    w1, b1 = lin(ks[0], a_dim, a_dim)
    w2, b2 = lin(ks[1], b_dim, b_dim)
    w3, b3 = lin(ks[2], a_dim + b_dim, a_dim)
    w4, b4 = lin(ks[3], a_dim, a_dim)
    return dict(w1=w1, b1=b1,
                w2=w2, b2=b2,
                w3=w3, w3a=w3[:a_dim], w3b=w3[a_dim:], b3=b3,
                w4=w4, b4=b4)


# ----------------------------------------------------------------------------
# Pure-JAX reference (mirrors the PyTorch forward exactly).
# ----------------------------------------------------------------------------
def trans_inten_reference(params, a_nchw, b_nchw):
    hp = jax.lax.Precision.HIGHEST
    a = jnp.mean(a_nchw, axis=(2, 3))
    b = jnp.mean(b_nchw, axis=(2, 3))
    f1 = _mish(jnp.dot(a, params["w1"], precision=hp) + params["b1"])
    f2 = _mish(jnp.dot(b, params["w2"], precision=hp) + params["b2"])
    f3 = _mish(jnp.dot(jnp.concatenate([f1, f2], axis=-1), params["w3"],
                       precision=hp) + params["b3"])
    inten = jax.nn.sigmoid(jnp.dot(f3, params["w4"], precision=hp) + params["b4"])
    return inten[:, :, None, None]


if __name__ == "__main__":
    a_dim, b_dim = 8, 8
    N, H, W = 2, 16, 16

    key = jax.random.PRNGKey(0)
    ka, kb, kp = jax.random.split(key, 3)
    a_feat = jax.random.normal(ka, (N, a_dim, H, W), jnp.float32)   # NCHW
    b_feat = jax.random.normal(kb, (N, b_dim, H, W), jnp.float32)   # NCHW
    params = make_params(a_dim, b_dim, kp)

    out = jax.block_until_ready(trans_inten_forward(params, a_feat, b_feat))
    ref = jax.block_until_ready(trans_inten_reference(params, a_feat, b_feat))

    assert out.shape == (N, a_dim, 1, 1), out.shape
    assert bool(jnp.all(jnp.isfinite(out)))
    assert jnp.allclose(out, ref, rtol=1e-4, atol=1e-4), float(jnp.abs(out - ref).max())
    print("KERNEL_OK")
</pallas_src>

<mosaic_0001>
module attributes {stable_mosaic.version = 11 : i64} {
  func.func @_trans_inten_kernel(%arg0: memref<2x8x256xf32, #tpu.memory_space<vmem>>, %arg1: memref<2x8x256xf32, #tpu.memory_space<vmem>>, %arg2: memref<8x8xf32, #tpu.memory_space<vmem>>, %arg3: memref<1x8xf32, #tpu.memory_space<vmem>>, %arg4: memref<8x8xf32, #tpu.memory_space<vmem>>, %arg5: memref<1x8xf32, #tpu.memory_space<vmem>>, %arg6: memref<8x8xf32, #tpu.memory_space<vmem>>, %arg7: memref<8x8xf32, #tpu.memory_space<vmem>>, %arg8: memref<1x8xf32, #tpu.memory_space<vmem>>, %arg9: memref<8x8xf32, #tpu.memory_space<vmem>>, %arg10: memref<1x8xf32, #tpu.memory_space<vmem>>, %arg11: memref<2x8xf32, #tpu.memory_space<vmem>>) attributes {dimension_semantics = [], scalar_prefetch = 0 : i64, scratch_operands = 0 : i64, tpu.core_type = #tpu.core_type<tc>} {
    %c0 = arith.constant 0 : index
    %c0_0 = arith.constant 0 : index
    %c0_1 = arith.constant 0 : index
    %0 = vector.load %arg0[%c0, %c0_0, %c0_1] : memref<2x8x256xf32, #tpu.memory_space<vmem>>, vector<2x8x256xf32>
    %cst = arith.constant dense<0.000000e+00> : vector<2x8xf32>
    %1 = vector.multi_reduction <add>, %0, %cst [2] : vector<2x8x256xf32> to vector<2x8xf32>
    %cst_2 = arith.constant 2.560000e+02 : f32
    %2 = vector.broadcast %cst_2 : f32 to vector<2x8xf32>
    %3 = arith.divf %1, %2 : vector<2x8xf32>
    %c0_3 = arith.constant 0 : index
    %c0_4 = arith.constant 0 : index
    %c0_5 = arith.constant 0 : index
    %4 = vector.load %arg1[%c0_3, %c0_4, %c0_5] : memref<2x8x256xf32, #tpu.memory_space<vmem>>, vector<2x8x256xf32>
    %cst_6 = arith.constant dense<0.000000e+00> : vector<2x8xf32>
    %5 = vector.multi_reduction <add>, %4, %cst_6 [2] : vector<2x8x256xf32> to vector<2x8xf32>
    %cst_7 = arith.constant 2.560000e+02 : f32
    %6 = vector.broadcast %cst_7 : f32 to vector<2x8xf32>
    %7 = arith.divf %5, %6 : vector<2x8xf32>
    %c0_8 = arith.constant 0 : index
    %c0_9 = arith.constant 0 : index
    %8 = vector.load %arg2[%c0_8, %c0_9] : memref<8x8xf32, #tpu.memory_space<vmem>>, vector<8x8xf32>
    %cst_10 = arith.constant dense<0.000000e+00> : vector<2x8xf32>
    %9 = tpu.matmul %3, %8, %cst_10 {dimension_numbers = #tpu.dot_dimension_numbers<[1], [0], [0], [1], [0, 0, 1, 1], [], []>} : vector<2x8xf32>, vector<8x8xf32>, vector<2x8xf32> -> vector<2x8xf32>
    %c0_11 = arith.constant 0 : index
    %c0_12 = arith.constant 0 : index
    %10 = vector.load %arg3[%c0_11, %c0_12] : memref<1x8xf32, #tpu.memory_space<vmem>>, vector<1x8xf32>
    %11 = vector.broadcast %10 : vector<1x8xf32> to vector<2x8xf32>
    %12 = arith.addf %9, %11 : vector<2x8xf32>
    %cst_13 = arith.constant 0.000000e+00 : f32
    %13 = vector.broadcast %cst_13 : f32 to vector<2x8xf32>
    %14 = arith.maximumf %12, %13 : vector<2x8xf32>
    %15 = math.absf %12 : vector<2x8xf32>
    %cst_14 = arith.constant 0.000000e+00 : f32
    %16 = vector.broadcast %cst_14 : f32 to vector<2x8xf32>
    %17 = arith.subf %16, %15 : vector<2x8xf32>
    %18 = math.exp %17 : vector<2x8xf32>
    %cst_15 = arith.constant 1.000000e+00 : f32
    %19 = vector.broadcast %cst_15 : f32 to vector<2x8xf32>
    %20 = arith.addf %19, %18 : vector<2x8xf32>
    %21 = math.log %20 : vector<2x8xf32>
    %22 = arith.addf %14, %21 : vector<2x8xf32>
    %23 = math.tanh %22 : vector<2x8xf32>
    %24 = arith.mulf %12, %23 : vector<2x8xf32>
    %c0_16 = arith.constant 0 : index
    %c0_17 = arith.constant 0 : index
    %25 = vector.load %arg4[%c0_16, %c0_17] : memref<8x8xf32, #tpu.memory_space<vmem>>, vector<8x8xf32>
    %cst_18 = arith.constant dense<0.000000e+00> : vector<2x8xf32>
    %26 = tpu.matmul %7, %25, %cst_18 {dimension_numbers = #tpu.dot_dimension_numbers<[1], [0], [0], [1], [0, 0, 1, 1], [], []>} : vector<2x8xf32>, vector<8x8xf32>, vector<2x8xf32> -> vector<2x8xf32>
    %c0_19 = arith.constant 0 : index
    %c0_20 = arith.constant 0 : index
    %27 = vector.load %arg5[%c0_19, %c0_20] : memref<1x8xf32, #tpu.memory_space<vmem>>, vector<1x8xf32>
    %28 = vector.broadcast %27 : vector<1x8xf32> to vector<2x8xf32>
    %29 = arith.addf %26, %28 : vector<2x8xf32>
    %cst_21 = arith.constant 0.000000e+00 : f32
    %30 = vector.broadcast %cst_21 : f32 to vector<2x8xf32>
    %31 = arith.maximumf %29, %30 : vector<2x8xf32>
    %32 = math.absf %29 : vector<2x8xf32>
    %cst_22 = arith.constant 0.000000e+00 : f32
    %33 = vector.broadcast %cst_22 : f32 to vector<2x8xf32>
    %34 = arith.subf %33, %32 : vector<2x8xf32>
    %35 = math.exp %34 : vector<2x8xf32>
    %cst_23 = arith.constant 1.000000e+00 : f32
    %36 = vector.broadcast %cst_23 : f32 to vector<2x8xf32>
    %37 = arith.addf %36, %35 : vector<2x8xf32>
    %38 = math.log %37 : vector<2x8xf32>
    %39 = arith.addf %31, %38 : vector<2x8xf32>
    %40 = math.tanh %39 : vector<2x8xf32>
    %41 = arith.mulf %29, %40 : vector<2x8xf32>
    %c0_24 = arith.constant 0 : index
    %c0_25 = arith.constant 0 : index
    %42 = vector.load %arg6[%c0_24, %c0_25] : memref<8x8xf32, #tpu.memory_space<vmem>>, vector<8x8xf32>
    %cst_26 = arith.constant dense<0.000000e+00> : vector<2x8xf32>
    %43 = tpu.matmul %24, %42, %cst_26 {dimension_numbers = #tpu.dot_dimension_numbers<[1], [0], [0], [1], [0, 0, 1, 1], [], []>} : vector<2x8xf32>, vector<8x8xf32>, vector<2x8xf32> -> vector<2x8xf32>
    %c0_27 = arith.constant 0 : index
    %c0_28 = arith.constant 0 : index
    %44 = vector.load %arg7[%c0_27, %c0_28] : memref<8x8xf32, #tpu.memory_space<vmem>>, vector<8x8xf32>
    %cst_29 = arith.constant dense<0.000000e+00> : vector<2x8xf32>
    %45 = tpu.matmul %41, %44, %cst_29 {dimension_numbers = #tpu.dot_dimension_numbers<[1], [0], [0], [1], [0, 0, 1, 1], [], []>} : vector<2x8xf32>, vector<8x8xf32>, vector<2x8xf32> -> vector<2x8xf32>
    %46 = arith.addf %43, %45 : vector<2x8xf32>
    %c0_30 = arith.constant 0 : index
    %c0_31 = arith.constant 0 : index
    %47 = vector.load %arg8[%c0_30, %c0_31] : memref<1x8xf32, #tpu.memory_space<vmem>>, vector<1x8xf32>
    %48 = vector.broadcast %47 : vector<1x8xf32> to vector<2x8xf32>
    %49 = arith.addf %46, %48 : vector<2x8xf32>
    %cst_32 = arith.constant 0.000000e+00 : f32
    %50 = vector.broadcast %cst_32 : f32 to vector<2x8xf32>
    %51 = arith.maximumf %49, %50 : vector<2x8xf32>
    %52 = math.absf %49 : vector<2x8xf32>
    %cst_33 = arith.constant 0.000000e+00 : f32
    %53 = vector.broadcast %cst_33 : f32 to vector<2x8xf32>
    %54 = arith.subf %53, %52 : vector<2x8xf32>
    %55 = math.exp %54 : vector<2x8xf32>
    %cst_34 = arith.constant 1.000000e+00 : f32
    %56 = vector.broadcast %cst_34 : f32 to vector<2x8xf32>
    %57 = arith.addf %56, %55 : vector<2x8xf32>
    %58 = math.log %57 : vector<2x8xf32>
    %59 = arith.addf %51, %58 : vector<2x8xf32>
    %60 = math.tanh %59 : vector<2x8xf32>
    %61 = arith.mulf %49, %60 : vector<2x8xf32>
    %c0_35 = arith.constant 0 : index
    %c0_36 = arith.constant 0 : index
    %62 = vector.load %arg9[%c0_35, %c0_36] : memref<8x8xf32, #tpu.memory_space<vmem>>, vector<8x8xf32>
    %cst_37 = arith.constant dense<0.000000e+00> : vector<2x8xf32>
    %63 = tpu.matmul %61, %62, %cst_37 {dimension_numbers = #tpu.dot_dimension_numbers<[1], [0], [0], [1], [0, 0, 1, 1], [], []>} : vector<2x8xf32>, vector<8x8xf32>, vector<2x8xf32> -> vector<2x8xf32>
    %c0_38 = arith.constant 0 : index
    %c0_39 = arith.constant 0 : index
    %64 = vector.load %arg10[%c0_38, %c0_39] : memref<1x8xf32, #tpu.memory_space<vmem>>, vector<1x8xf32>
    %65 = vector.broadcast %64 : vector<1x8xf32> to vector<2x8xf32>
    %66 = arith.addf %63, %65 : vector<2x8xf32>
    %67 = arith.negf %66 : vector<2x8xf32>
    %68 = math.exp %67 : vector<2x8xf32>
    %cst_40 = arith.constant 1.000000e+00 : f32
    %69 = vector.broadcast %cst_40 : f32 to vector<2x8xf32>
    %70 = arith.addf %69, %68 : vector<2x8xf32>
    %71 = arith.divf %69, %70 : vector<2x8xf32>
    %c0_41 = arith.constant 0 : index
    %c0_42 = arith.constant 0 : index
    %72 = vector.load %arg11[%c0_41, %c0_42] : memref<2x8xf32, #tpu.memory_space<vmem>>, vector<2x8xf32>
    tpu.vector_store %arg11[%c0_41, %c0_42], %71 {strides = array<i32>} : memref<2x8xf32, #tpu.memory_space<vmem>>, vector<2x8xf32>,
    return
  }
}

</mosaic_0001>

<bundles_post_ra>
// kernel: tpu_custom_call.1
= control target key start
LH: loop header
LB: loop body
LE: loop exit
PB: predicated region body
PF: predicated region fallthrough
CT: control target
= control target key end

     0   :  { %16 = vsyncpa [#allocation3], 0  ;;  %s839_s0 = inlined_call_operand.hbm [shape: f32[2,8,256], index: 0, kind: input, shape index: {}]   ;;  %s840_s1 = inlined_call_operand.hbm [shape: f32[2,8,256], index: 1, kind: input, shape index: {}]   ;;  %s841_s2 = inlined_call_operand.hbm [shape: f32[8,8], index: 2, kind: input, shape index: {}]   ;;  %s842_s3 = inlined_call_operand.hbm [shape: f32[1,8], index: 3, kind: input, shape index: {}]   ;;  %s843_s4 = inlined_call_operand.hbm [shape: f32[8,8], index: 4, kind: input, shape index: {}]   ;;  %s844_s5 = inlined_call_operand.hbm [shape: f32[1,8], index: 5, kind: input, shape index: {}]   ;;  %s845_s6 = inlined_call_operand.hbm [shape: f32[8,8], index: 6, kind: input, shape index: {}]   ;;  %s846_s7 = inlined_call_operand.hbm [shape: f32[8,8], index: 7, kind: input, shape index: {}]   ;;  %s847_s8 = inlined_call_operand.hbm [shape: f32[1,8], index: 8, kind: input, shape index: {}]   ;;  %s848_s9 = inlined_call_operand.vmem [shape: f32[8,8], index: 9, kind: input, shape index: {}]   ;;  %s849_s10 = inlined_call_operand.vmem [shape: f32[1,8], index: 10, kind: input, shape index: {}]   ;;  %s850_s11 = inlined_call_operand.hbm [shape: f32[2,8], index: 11, kind: output, shape index: {}]  }
   0x1   :  { %17 = vsyncpa [#allocation6], 0 }
   0x2   :  { %18 = vsyncpa [#allocation9], 0 }
   0x3   :  { %19 = vsyncpa [#allocation12], 0 }
   0x4   :  { %20 = vsyncpa [#allocation15], 0 }
   0x5   :  { %21 = vsyncpa [#allocation4], 0  ;;  %s39_s19 = sshll.u32 %s840_s1, 4  ;;  %s719_s20 = smov [#allocation5]   ;;  %s40_s19 = int_to_ptr.hbm [resolvable:$true] %s39_s19 }
   0x6   :  { %s41_s21 = sshll.u32 %s719_s20, 4  ;;  %s64_s24 = sshll.u32 %s842_s3, 4  ;;  %s42_s21 = int_to_ptr.vmem [resolvable:$true] %s41_s21  ;;  %s65_s24 = int_to_ptr.hbm [resolvable:$true] %s64_s24 }
   0x7   :  { %s720_s25 = smov 256   ;;  %s721_s26 = smov 16  }
   0x8   :  { %47 = dma.hbm_to_vmem [thread:$0]  %s40_s19, 512, %s42_s21, [#allocation6], %s720_s25, %s720_s25, %s721_s26  }
   0x9   :  { %s722_s27 = smov [#allocation8]   ;;  %s86_s1 = sshll.u32 %s844_s5, 4  ;;  %s87_s1 = int_to_ptr.hbm [resolvable:$true] %s86_s1 }
   0xa   :  { %s66_s28 = sshll.u32 %s722_s27, 4  ;;  %s108_s3 = sshll.u32 %s846_s7, 4  ;;  %s67_s28 = int_to_ptr.vmem [resolvable:$true] %s66_s28  ;;  %s109_s3 = int_to_ptr.hbm [resolvable:$true] %s108_s3 }
   0xb   :  { %69 = dma.hbm_to_vmem [thread:$0]  %s65_s24, 16, %s67_s28, [#allocation9]  }
   0xc   :  { %s723_s14 = smov [#allocation11]   ;;  %s724_s16 = smov [#allocation14]  }
   0xd   :  { %s88_s15 = sshll.u32 %s723_s14, 4  ;;  %s110_s17 = sshll.u32 %s724_s16, 4  ;;  %s89_s15 = int_to_ptr.vmem [resolvable:$true] %s88_s15  ;;  %s111_s17 = int_to_ptr.vmem [resolvable:$true] %s110_s17 }
   0xe   :  { %91 = dma.hbm_to_vmem [thread:$0]  %s87_s1, 16, %s89_s15, [#allocation12]  }
   0xf   :  { %s26_s20 = sshll.u32 %s839_s0, 4  ;;  %s53_s22 = sshll.u32 %s841_s2, 4  ;;  %s27_s20 = int_to_ptr.hbm [resolvable:$true] %s26_s20  ;;  %s54_s22 = int_to_ptr.hbm [resolvable:$true] %s53_s22 }
  0x10   :  { %113 = dma.hbm_to_vmem [thread:$0]  %s109_s3, 128, %s111_s17, [#allocation15]  }
  0x11   :  { %s725_s23 = smov [#allocation2]   ;;  %s726_s24 = smov [#allocation7]  }
  0x12   :  { %s28_s7 = sshll.u32 %s725_s23, 4  ;;  %s55_s27 = sshll.u32 %s726_s24, 4  ;;  %s29_s7 = int_to_ptr.vmem [resolvable:$true] %s28_s7  ;;  %s56_s27 = int_to_ptr.vmem [resolvable:$true] %s55_s27 }
  0x13   :  { %34 = dma.hbm_to_vmem [thread:$0]  %s27_s20, 512, %s29_s7, [#allocation3], %s720_s25, %s720_s25, %s721_s26  }
  0x14   :  { %s75_s0 = sshll.u32 %s843_s4, 4  ;;  %s97_s2 = sshll.u32 %s845_s6, 4  ;;  %s76_s0 = int_to_ptr.hbm [resolvable:$true] %s75_s0  ;;  %s98_s2 = int_to_ptr.hbm [resolvable:$true] %s97_s2 }
  0x15   :  { %58 = dma.hbm_to_vmem [thread:$0]  %s54_s22, 128, %s56_s27, [#allocation6]  }
  0x16   :  { %s727_s12 = smov [#allocation10]   ;;  %s728_s3 = smov [#allocation13]  }
  0x17   :  { %s77_s13 = sshll.u32 %s727_s12, 4  ;;  %s99_s25 = sshll.u32 %s728_s3, 4  ;;  %s78_s13 = int_to_ptr.vmem [resolvable:$true] %s77_s13  ;;  %s100_s25 = int_to_ptr.vmem [resolvable:$true] %s99_s25 }
  0x18   :  { %80 = dma.hbm_to_vmem [thread:$0]  %s76_s0, 128, %s78_s13, [#allocation9]  }
  0x19   :  { %s119_s15 = sshll.u32 %s847_s8, 4  ;;  %s729_s4 = smov [#allocation16]   ;;  %s120_s15 = int_to_ptr.hbm [resolvable:$true] %s119_s15 }
  0x1a   :  { %102 = dma.hbm_to_vmem [thread:$0]  %s98_s2, 128, %s100_s25, [#allocation12]  }
  0x1b   :  { %s121_s16 = sshll.u32 %s729_s4, 4  ;;  %s122_s16 = int_to_ptr.vmem [resolvable:$true] %s121_s16 }
  0x1c   :  { %124 = dma.hbm_to_vmem [thread:$0]  %s120_s15, 16, %s122_s16, [#allocation15]  }
  0x1d   :  { %707 = dma.done.wait [#allocation3], 512  }
  0x1e   :  { %708 = vsyncadd [#allocation3], 4294966784 }
  0x1f   :  { %709 = dma.done.wait [#allocation6], 640  }
  0x20   :  { %710 = vsyncadd [#allocation6], 4294966656 }
  0x21   :  { %711 = dma.done.wait [#allocation9], 144  }
  0x22   :  { %712 = vsyncadd [#allocation9], 4294967152 }
  0x23   :  { %713 = dma.done.wait [#allocation12], 144  }
  0x24   :  { %714 = vsyncadd [#allocation12], 4294967152 }
  0x25   :  { %715 = dma.done.wait [#allocation15], 144  }
  0x26   :  { %716 = vsyncadd [#allocation15], 4294967152  ;;  %v184_v0 = vld [vmem:[#allocation5] sm:$0xff]  ;;  %v185_v1 = vld [vmem:[#allocation5 + $0x8] sm:$0xff]  ;;  %v730_v12 = vmov 256.0   ;;  %v203_v22 = vlaneseq  ;;  %vm207_vm1 = vcmask 1041409  }
  0x27   :  { %v165_v2 = vld [vmem:[#allocation2] sm:$0xff]  ;;  %v188_v3 = vadd.f32 %v185_v1, %v184_v0  ;;  %v166_v4 = vld [vmem:[#allocation2 + $0x8] sm:$0xff]  ;;  %v186_v6 = vld [vmem:[#allocation5 + $0x10] sm:$0xff]  ;;  %443 = vrcp.f32 %v730_v12  ;;  %vm209_vm2 = vcmask 64512   ;;  %vm397_vm6 = vcmask 58368  }
  0x28   :  { %v169_v5 = vadd.f32 %v166_v4, %v165_v2  ;;  %v187_v7 = vld [vmem:[#allocation5 + $0x18] sm:$0xff]  ;;  %v167_v8 = vld [vmem:[#allocation2 + $0x10] sm:$0xff]  ;;  %v196_v13 = vld [vmem:[#allocation7] sm:$0xff]  ;;  %v204_v24 = vand.u32 127, %v203_v22 }
  0x29   :  { %189 = vadd.xlane.f32.xlu1 %v188_v3  ;;  %v168_v9 = vld [vmem:[#allocation2 + $0x18] sm:$0xff]  ;;  %v191_v10 = vadd.f32 %v187_v7, %v186_v6  ;;  %v243_v14 = vld [vmem:[#allocation10] sm:$0xff]  ;;  %227 = vmatpush.msra.mxu0 %v196_v13  ;;  %v440_v37 = vld [vmem:[#allocation11] ss:$0 sm:$0xff] }
  0x2a   :  { %170 = vadd.xlane.f32.xlu0 %v169_v5  ;;  %v172_v11 = vadd.f32 %v168_v9, %v167_v8  ;;  %270 = vmatpush.msra.mxu1 %v243_v14  ;;  %v439_v38 = vld [vmem:[#allocation8] ss:$0 sm:$0xff]  ;;  %v287_v39 = vld [vmem:[#allocation14] sm:$0xff]  ;;  %v286_v40 = vld [vmem:[#allocation13] sm:$0xff] }
  0x2b   :  { %306 = vmatpush.msra.mxu2 %v287_v39  ;;  %329 = vmatpush.msra.mxu3 %v286_v40  ;;  %v441_v4 = vld [vmem:[#allocation16] ss:$0 sm:$0xff] }
  0x2c   :  { %v350_v9 = vld [vmem:[%s848_s9] sm:$0xff]  ;;  %s731_s9 = smov [#allocation17]  }
  0x2d   :  { %v444_v15 = vpop.eup %443  ;;  %373 = vmatpush.msrb.mxu0 %v350_v9  ;;  %s404_s19 = sshll.u32 %s731_s9, 4  ;;  %s405_s19 = int_to_ptr.vmem [resolvable:$true] %s404_s19 }
  0x2e   :  { %v176_v16 = vmul.f32 256.0, %v444_v15  ;;  %vm180_vm0 = vweird.f32 %v444_v15 }
  0x30   :  { %v177_v17 = vsub.f32 1.0, %v176_v16 }
  0x31   :  { %192 = vadd.xlane.f32.xlu1 %v191_v10 }
  0x32   :  { %173 = vadd.xlane.f32.xlu0 %v172_v11  ;;  %v178_v18 = vmul.f32 %v444_v15, %v177_v17 }
  0x34   :  { %v179_v19 = vadd.f32 %v444_v15, %v178_v18 }
  0x36   :  { %v181_v23 = vsel %vm180_vm0, %v444_v15, %v179_v19 }
  0x9c   :  { %v190_v20 = vpop.xlane.xlu1 %189 }
  0x9d   :  { %v171_v21 = vpop.xlane.xlu0 %170  ;;  %v194_v25 = vmul.f32 %v190_v20, %v181_v23  ;;  %v442_v20 = vld [vmem:[%s849_s10] ss:$0 sm:$0xff]  ;;  %s406_s10 = sshll.u32 %s850_s11, 4  ;;  %s407_s10 = int_to_ptr.hbm [resolvable:$true] %s406_s10 }
  0x9e   :  { %v182_v26 = vmul.f32 %v181_v23, %v171_v21 }
  0x9f   :  { %v250_v31 = vperm.slane %v194_v25, %v204_v24 }
  0xa0   :  { %v205_v33 = vperm.slane %v182_v26, %v204_v24 }
  0xa4   :  { %v193_v27 = vpop.xlane.xlu1 %192 }
  0xa5   :  { %v195_v28 = vmul.f32 %v193_v27, %v181_v23  ;;  %v174_v29 = vpop.xlane.xlu0 %173 }
  0xa6   :  { %v183_v30 = vmul.f32 %v181_v23, %v174_v29 }
  0xa7   :  { %v251_v32 = vperm.slane %v195_v28, %v204_v24 }
  0xa8   :  { %v206_v34 = vperm.slane %v183_v30, %v204_v24 }
  0xa9   :  { %v252_v35 = vsel %vm207_vm1, %v251_v32, %v250_v31 }
  0xaa   :  { %v208_v36 = vsel %vm207_vm1, %v206_v34, %v205_v33  ;;  %421 = vmatmul.msk.f32.vlgmr.msra.gmra.mxu1 %vm209_vm2, %v252_v35 }
  0xab   :  { %420 = vmatmul.msk.f32.vlgmr.msra.gmra.mxu0 %vm209_vm2, %v208_v36 }
 0x127   :  { %v272_v41 = vpop.f32.mrf.mxu1 }
 0x128   :  { %v229_v42 = vpop.f32.mrf.mxu0  ;;  %v273_v43 = vadd.f32 %v440_v37, %v272_v41 }
 0x129   :  { %v230_v44 = vadd.f32 %v439_v38, %v229_v42 }
 0x12a   :  { %v276_v45 = vand.u32 2147483647, %v273_v43  ;;  %v275_v57 = vmax.f32 %v273_v43, 0.0 }
 0x12b   :  { %v233_v46 = vand.u32 2147483647, %v230_v44  ;;  %v232_v59 = vmax.f32 %v230_v44, 0.0 }
 0x12c   :  { %v277_v47 = vsub.f32 0.0, %v276_v45 }
 0x12d   :  { %v234_v48 = vsub.f32 0.0, %v233_v46 }
 0x12e   :  { %v278_v49 = vmul.f32 1.442695, %v277_v47 }
 0x12f   :  { %v235_v50 = vmul.f32 1.442695, %v234_v48 }
 0x130   :  { %445 = vpow2.f32 %v278_v49 }
 0x131   :  { %447 = vpow2.f32 %v235_v50 }
 0x136   :  { %v446_v51 = vpop.eup %445 }
 0x137   :  { %v448_v52 = vpop.eup %447  ;;  %v280_v53 = vadd.f32 1.0, %v446_v51 }
 0x138   :  { %v237_v54 = vadd.f32 1.0, %v448_v52 }
 0x139   :  { %449 = vlog2.f32 %v280_v53 }
 0x13a   :  { %451 = vlog2.f32 %v237_v54 }
 0x13f   :  { %v450_v55 = vpop.eup %449 }
 0x140   :  { %v452_v56 = vpop.eup %451  ;;  %v282_v58 = vmul.f32 0.6931472, %v450_v55 }
 0x141   :  { %v239_v60 = vmul.f32 0.6931472, %v452_v56 }
 0x142   :  { %v283_v61 = vadd.f32 %v282_v58, %v275_v57 }
 0x143   :  { %v240_v62 = vadd.f32 %v239_v60, %v232_v59 }
 0x144   :  { %453 = vtanh.f32 %v283_v61 }
 0x145   :  { %455 = vtanh.f32 %v240_v62 }
 0x14a   :  { %v454_v63 = vpop.eup %453 }
 0x14b   :  { %v456_v0 = vpop.eup %455  ;;  %v285_v1 = vmul.f32 %v454_v63, %v273_v43 }
 0x14c   :  { %v242_v2 = vmul.f32 %v456_v0, %v230_v44 }
 0x14d   :  { %422 = vmatmul.msk.f32.vlgmr.msra.gmra.mxu2 %vm209_vm2, %v285_v1 }
 0x14e   :  { %423 = vmatmul.msk.f32.vlgmr.msra.gmra.mxu3 %vm209_vm2, %v242_v2 }
 0x1d0   :  { %v308_v3 = vpop.f32.mrf.mxu2 }
 0x1d1   :  { %v331_v5 = vpop.f32.mrf.mxu3 }
 0x1d2   :  { %v332_v6 = vadd.f32 %v331_v5, %v308_v3 }
 0x1d4   :  { %v338_v7 = vadd.f32 %v441_v4, %v332_v6 }
 0x1d6   :  { %v340_v8 = vand.u32 2147483647, %v338_v7  ;;  %v339_v15 = vmax.f32 %v338_v7, 0.0 }
 0x1d8   :  { %v341_v10 = vsub.f32 0.0, %v340_v8 }
 0x1da   :  { %v342_v11 = vmul.f32 1.442695, %v341_v10 }
 0x1dc   :  { %457 = vpow2.f32 %v342_v11 }
 0x1e2   :  { %v458_v12 = vpop.eup %457 }
 0x1e3   :  { %v344_v13 = vadd.f32 1.0, %v458_v12 }
 0x1e5   :  { %459 = vlog2.f32 %v344_v13 }
 0x1eb   :  { %v460_v14 = vpop.eup %459 }
 0x1ec   :  { %v346_v16 = vmul.f32 0.6931472, %v460_v14 }
 0x1ee   :  { %v347_v17 = vadd.f32 %v346_v16, %v339_v15 }
 0x1f0   :  { %461 = vtanh.f32 %v347_v17 }
 0x1f6   :  { %v462_v18 = vpop.eup %461 }
 0x1f7   :  { %v349_v19 = vmul.f32 %v462_v18, %v338_v7 }
 0x1f9   :  { %424 = vmatmul.msk.f32.vlgmr.msrb.gmra.mxu0 %vm209_vm2, %v349_v19 }
 0x276   :  { %v375_v21 = vpop.f32.mrf.mxu0 }
 0x277   :  { %v376_v22 = vadd.f32 %v442_v20, %v375_v21 }
 0x279   :  { %v425_v23 = vmul.f32 -1.442695, %v376_v22 }
 0x27b   :  { %463 = vpow2.f32 %v425_v23 }
 0x281   :  { %v464_v24 = vpop.eup %463 }
 0x282   :  { %v381_v25 = vadd.f32 1.0, %v464_v24 }
 0x284   :  { %465 = vrcp.f32 %v381_v25  ;;  %v393_v29 = vand.u32 2147483648, %v381_v25  ;;  %v391_v31 = vand.u32 2147483647, %v381_v25  ;;  %vm387_vm4 = vweird.f32 %v381_v25 }
 0x286   :  { %v394_v33 = vor.u32 1.1754944e-38, %v393_v29  ;;  %vm392_vm7 = vcmp.eq.f32.partialorder %v391_v31, 8.507059e+37 }
 0x28a   :  { %v466_v26 = vpop.eup %465 }
 0x28b   :  { %v383_v27 = vmul.f32 %v466_v26, %v381_v25  ;;  %vm388_vm3 = vweird.f32 %v466_v26 }
 0x28c   :  { %vm389_vm5 = vmor %vm387_vm4, %vm388_vm3 }
 0x28d   :  { %v384_v28 = vsub.f32 1.0, %v383_v27 }
 0x28f   :  { %v385_v30 = vmul.f32 %v466_v26, %v384_v28 }
 0x291   :  { %v386_v32 = vadd.f32 %v466_v26, %v385_v30 }
 0x293   :  { %v390_v34 = vsel %vm389_vm5, %v466_v26, %v386_v32 }
 0x294   :  { %v395_v35 = vsel %vm392_vm7, %v394_v33, %v390_v34 }
 0x295   :  { %398 = vst.msk [vmem:[#allocation17] sm:$0x3] %vm397_vm6, %v395_v35 }
 0x296   :  { %409 = dma.vmem_to_hbm [thread:$0]  %s405_s19, 32, %s407_s10, [#allocation4]  }
 0x297   :  { %717 = dma.done.wait [#allocation4], 32  }
 0x298   :  { %718 = vsyncadd [#allocation4], 4294967264 }
 0x299   :  { %414 = vsyncpa [#allocation3], 1 }
 0x29a   :  { %415 = vsyncpa [#allocation6], 1 }
 0x29b   :  { %416 = vsyncpa [#allocation9], 1 }
 0x29c   :  { %417 = vsyncpa [#allocation12], 1 }
 0x29d   :  { %418 = vsyncpa [#allocation15], 1 }
 0x29e   :  { %419 = vsyncpa [#allocation4], 1 }

</bundles_post_ra>
